<compile_context>
chip_gen: v5e
topology: v5e:2x2
jax: 0.10.0
libtpu: 0.0.40
codegen_flags: <defaults>
</compile_context>

<pallas_src>
import functools

import jax
import jax.numpy as jnp
from jax.experimental import pallas as pl
from jax.experimental.pallas import tpu as pltpu


def _round_up(x: int, m: int) -> int:
    return ((x + m - 1) // m) * m


def _batch_sum_kernel(x_ref, o_ref, acc_ref, *, true_b: int, tile_b: int,
                      tiles_per_shard: int, group: int):
    """Streaming column-sum of X. Grid = (shard ["parallel"], tile ["arbitrary"])."""
    c = pl.program_id(0)           # shard axis (split across TCs on v7x)
    i = pl.program_id(1)           # tile-within-shard axis (reduction)

    @pl.when(i == 0)
    def _init():
        acc_ref[...] = jnp.zeros_like(acc_ref)

    gtile = c * tiles_per_shard + i          # unclamped global tile index
    row0 = gtile * tile_b
    d = x_ref.shape[-1]

    def _accum(x):
        # Sublane-dense partial sum: (tile_b, d) -> (group, d).
        # The reshape matches the native (group, 128) tiling, so this lowers
        # to pure per-vreg VALU adds (no per-step XLU reduce).
        acc_ref[...] += jnp.sum(x.reshape(tile_b // group, group, d),
                                axis=0, dtype=jnp.float32)

    is_full = row0 + tile_b <= true_b

    @pl.when(is_full)
    def _full_tile():
        _accum(x_ref[...])

    @pl.when(jnp.logical_not(is_full))
    def _ragged_tile():
        # Ragged / duplicated tail tile: zero out rows >= true_b (the VMEM
        # buffer past the array edge is unspecified).
        rows = row0 + jax.lax.broadcasted_iota(jnp.int32, (tile_b, 1), 0)
        _accum(jnp.where(rows < true_b, x_ref[...], 0))

    @pl.when(i == pl.num_programs(1) - 1)
    def _finalize():
        # Single cross-sublane collapse per shard: (group, d) -> (1, d).
        o_ref[...] = jnp.sum(acc_ref[...], axis=0, keepdims=True)


def low_rank_lre_forward(subject_activations, u, s, v, bias, *,
                         normalize: bool = False, batch_tile: int | None = None):
    """Pallas forward for LowRankLre ('mean' object aggregation).

    subject_activations: (B, d_in); u: (d_out, r); s: (r,); v: (d_in, r);
    bias: (d_out,).  Returns the (d_out,) object activation (float32).
    """
    B, d_in = subject_activations.shape
    d_out, r = u.shape
    x_itemsize = jnp.dtype(subject_activations.dtype).itemsize

    # dtype-aware sublane multiple: 8 (f32) / 16 (bf16) / 32 (int8/fp8).
    sub = {1: 32, 2: 16, 4: 8}.get(x_itemsize, 8)

    try:
        info = pltpu.get_tpu_info()
        vmem_cap = int(getattr(info, "vmem_capacity_bytes", 64 * 1024 * 1024))
    except Exception:  # pragma: no cover - conservative (v7x-sized) fallback
        vmem_cap = 64 * 1024 * 1024

    # Per-buffer X budget: a quarter of VMEM, capped at 16 MiB (=> up to
    # 32 MiB double-buffered), amortizing per-grid-step overhead on v7x/v6e.
    per_buf = max(sub * d_in * x_itemsize,
                  min(16 * 1024 * 1024, vmem_cap // 4))
    max_tb = max(sub, per_buf // (d_in * x_itemsize))
    tb = min(max_tb, _round_up(B, sub))
    if batch_tile is not None:
        tb = min(tb, max(sub, _round_up(batch_tile, sub)))
    tb = max(sub, (tb // sub) * sub)

    n_tiles = pl.cdiv(B, tb)
    num_shards = 2 if n_tiles >= 2 else 1      # megacore split on v7x
    tiles_per_shard = pl.cdiv(n_tiles, num_shards)

    kernel = functools.partial(
        _batch_sum_kernel, true_b=B, tile_b=tb,
        tiles_per_shard=tiles_per_shard, group=sub)

    def x_index_map(c, i):
        # Clamp so duplicated trailing grid points re-read a valid tile; the
        # in-kernel row mask zeroes their contribution.
        return (jnp.minimum(c * tiles_per_shard + i, n_tiles - 1), 0)

    # VMEM budget from the ACTUAL tile: double-buffered X + scratch + out,
    # capped well inside physical VMEM on every generation.
    est = (2 * tb * d_in * x_itemsize + sub * d_in * 4
           + 2 * num_shards * d_in * 4 + (1 << 20))
    vmem_limit = int(min(max(est, 32 * 1024 * 1024), (vmem_cap * 3) // 4))

    cost = pl.CostEstimate(
        flops=2 * B * d_in,
        transcendentals=0,
        bytes_accessed=B * d_in * x_itemsize + num_shards * d_in * 4)

    partial_sums = pl.pallas_call(
        kernel,
        out_shape=jax.ShapeDtypeStruct((num_shards, d_in), jnp.float32),
        grid=(num_shards, tiles_per_shard),
        in_specs=[pl.BlockSpec((tb, d_in), x_index_map)],
        out_specs=pl.BlockSpec((1, d_in), lambda c, i: (c, 0)),
        scratch_shapes=[pltpu.VMEM((sub, d_in), jnp.float32)],
        compiler_params=pltpu.CompilerParams(
            dimension_semantics=("parallel", "arbitrary"),
            vmem_limit_bytes=vmem_limit),
        cost_estimate=cost,
    )(subject_activations)

    # Rank-r epilogue in plain JAX (trivial FLOPs; native-dtype MXU operands
    # with f32 accumulation; no in-kernel param residency).
    x_mean = partial_sums.sum(axis=0) / jnp.float32(B)              # (d_in,)
    p = jnp.dot(x_mean, v, preferred_element_type=jnp.float32)      # (r,)
    p = p * s.astype(jnp.float32)
    vec = jax.lax.dot_general(p, u, (((0,), (1,)), ((), ())),
                              preferred_element_type=jnp.float32)   # (d_out,)
    vec = vec + bias.astype(jnp.float32)
    if normalize:
        vec = vec / jnp.linalg.norm(vec)                            # no eps, as torch
    return vec


def _reference(subject_activations, u, s, v, bias, normalize=False):
    ws = u @ jnp.diag(s) @ (v.T @ subject_activations.T)            # (d_out, B)
    vec = (ws + bias[:, None]).mean(axis=1)
    if normalize:
        vec = vec / jnp.linalg.norm(vec)
    return vec


if __name__ == "__main__":
    key = jax.random.PRNGKey(0)
    B, hidden, rank = 8, 128, 16   # d_in == d_out == hidden

    k1, k2, k3, k4, k5 = jax.random.split(key, 5)
    x = jax.random.normal(k1, (B, hidden), dtype=jnp.float32)
    u = jax.random.normal(k2, (hidden, rank), dtype=jnp.float32)
    s = jax.random.uniform(k3, (rank,), dtype=jnp.float32, minval=0.5, maxval=2.0)
    v = jax.random.normal(k4, (hidden, rank), dtype=jnp.float32)
    bias = jax.random.normal(k5, (hidden,), dtype=jnp.float32)

    # Basic path.
    out = jax.block_until_ready(
        low_rank_lre_forward(x, u, s, v, bias, normalize=False))
    ref = _reference(x, u, s, v, bias, normalize=False)
    assert jnp.allclose(out, ref, atol=1e-3, rtol=1e-3), "mismatch (no norm)"

    # Normalized path.
    out_n = jax.block_until_ready(
        low_rank_lre_forward(x, u, s, v, bias, normalize=True))
    ref_n = _reference(x, u, s, v, bias, normalize=True)
    assert jnp.allclose(out_n, ref_n, atol=1e-3, rtol=1e-3), "mismatch (norm)"

    # Ragged batch handled by in-kernel masking (13 rows, 16-row tile).
    x2 = jax.random.normal(jax.random.PRNGKey(7), (13, hidden), dtype=jnp.float32)
    out2 = jax.block_until_ready(low_rank_lre_forward(x2, u, s, v, bias))
    ref2 = _reference(x2, u, s, v, bias)
    assert jnp.allclose(out2, ref2, atol=1e-3, rtol=1e-3), "mismatch (ragged B)"

    # Multi-tile, multi-shard accumulation (3 tiles split over 2 shards,
    # with one fully-masked duplicated tail tile).
    x3 = jax.random.normal(jax.random.PRNGKey(11), (24, hidden), dtype=jnp.float32)
    out3 = jax.block_until_ready(
        low_rank_lre_forward(x3, u, s, v, bias, batch_tile=8))
    ref3 = _reference(x3, u, s, v, bias)
    assert jnp.allclose(out3, ref3, atol=1e-3, rtol=1e-3), "mismatch (tiled B)"

    print("KERNEL_OK")
</pallas_src>

<mosaic_0001>
module attributes {stable_mosaic.version = 11 : i64} {
  func.func @_batch_sum_kernel(%arg0: i32, %arg1: i32, %arg2: memref<8x128xf32, #tpu.memory_space<vmem>>, %arg3: memref<1x128xf32, #tpu.memory_space<vmem>>, %arg4: memref<8x128xf32, #tpu.memory_space<vmem>>) attributes {dimension_semantics = [#tpu.dimension_semantics<parallel>, #tpu.dimension_semantics<arbitrary>], iteration_bounds = array<i64: 1, 1>, scalar_prefetch = 0 : i64, scratch_operands = 1 : i64, tpu.core_type = #tpu.core_type<tc>, window_params = [{transform_indices = @transform_0, window_bounds = array<i64: 8, 128>}, {transform_indices = @transform_1, window_bounds = array<i64: 1, 128>}]} {
    %c0_i32 = arith.constant 0 : i32
    %0 = arith.cmpi eq, %arg1, %c0_i32 : i32
    %1 = arith.extui %0 : i1 to i32
    %c0_i32_0 = arith.constant 0 : i32
    %2 = arith.cmpi ne, %1, %c0_i32_0 : i32
    scf.if %2 {
      %cst = arith.constant 0.000000e+00 : f32
      %16 = vector.broadcast %cst : f32 to vector<8x128xf32>
      %c0 = arith.constant 0 : index
      %c0_7 = arith.constant 0 : index
      %17 = vector.load %arg4[%c0, %c0_7] : memref<8x128xf32, #tpu.memory_space<vmem>>, vector<8x128xf32>
      tpu.vector_store %arg4[%c0, %c0_7], %16 {strides = array<i32>} : memref<8x128xf32, #tpu.memory_space<vmem>>, vector<8x128xf32>,
    } else {
    }
    %c1_i32 = arith.constant 1 : i32
    %3 = arith.muli %arg0, %c1_i32 : i32
    %4 = arith.addi %3, %arg1 : i32
    %c8_i32 = arith.constant 8 : i32
    %5 = arith.muli %4, %c8_i32 : i32
    %c8_i32_1 = arith.constant 8 : i32
    %6 = arith.addi %5, %c8_i32_1 : i32
    %c8_i32_2 = arith.constant 8 : i32
    %7 = arith.cmpi sle, %6, %c8_i32_2 : i32
    %8 = arith.extui %7 : i1 to i32
    %c0_i32_3 = arith.constant 0 : i32
    %9 = arith.cmpi ne, %8, %c0_i32_3 : i32
    scf.if %9 {
      %c0 = arith.constant 0 : index
      %c0_7 = arith.constant 0 : index
      %16 = vector.load %arg2[%c0, %c0_7] : memref<8x128xf32, #tpu.memory_space<vmem>>, vector<8x128xf32>
      %c0_8 = arith.constant 0 : index
      %c0_9 = arith.constant 0 : index
      %17 = vector.load %arg4[%c0_8, %c0_9] : memref<8x128xf32, #tpu.memory_space<vmem>>, vector<8x128xf32>
      %18 = vector.shape_cast %16 : vector<8x128xf32> to vector<1x8x128xf32>
      %cst = arith.constant dense<0.000000e+00> : vector<8x128xf32>
      %19 = vector.multi_reduction <add>, %18, %cst [0] : vector<1x8x128xf32> to vector<8x128xf32>
      %20 = arith.addf %17, %19 : vector<8x128xf32>
      %c0_10 = arith.constant 0 : index
      %c0_11 = arith.constant 0 : index
      %21 = vector.load %arg4[%c0_10, %c0_11] : memref<8x128xf32, #tpu.memory_space<vmem>>, vector<8x128xf32>
      tpu.vector_store %arg4[%c0_10, %c0_11], %20 {strides = array<i32>} : memref<8x128xf32, #tpu.memory_space<vmem>>, vector<8x128xf32>,
    } else {
    }
    %true = arith.constant true
    %10 = arith.xori %7, %true : i1
    %11 = arith.extui %10 : i1 to i32
    %c0_i32_4 = arith.constant 0 : i32
    %12 = arith.cmpi ne, %11, %c0_i32_4 : i32
    scf.if %12 {
      %16 = tpu.iota {dimensions = array<i32: 0>} : vector<8x1xi32>
      %17 = vector.broadcast %5 : i32 to vector<8x1xi32>
      %18 = arith.addi %17, %16 : vector<8x1xi32>
      %c8_i32_7 = arith.constant 8 : i32
      %19 = vector.broadcast %c8_i32_7 : i32 to vector<8x1xi32>
      %20 = arith.cmpi slt, %18, %19 : vector<8x1xi32>
      %c0 = arith.constant 0 : index
      %c0_8 = arith.constant 0 : index
      %21 = vector.load %arg2[%c0, %c0_8] : memref<8x128xf32, #tpu.memory_space<vmem>>, vector<8x128xf32>
      %c0_i32_9 = arith.constant 0 : i32
      %22 = arith.sitofp %c0_i32_9 : i32 to f32
      %23 = vector.shape_cast %20 : vector<8x1xi1> to vector<8x1xi1>
      %24 = vector.broadcast %23 : vector<8x1xi1> to vector<8x128xi1>
      %25 = vector.broadcast %22 : f32 to vector<8x128xf32>
      %26 = arith.select %24, %21, %25 : vector<8x128xi1>, vector<8x128xf32>
      %c0_10 = arith.constant 0 : index
      %c0_11 = arith.constant 0 : index
      %27 = vector.load %arg4[%c0_10, %c0_11] : memref<8x128xf32, #tpu.memory_space<vmem>>, vector<8x128xf32>
      %28 = vector.shape_cast %26 : vector<8x128xf32> to vector<1x8x128xf32>
      %cst = arith.constant dense<0.000000e+00> : vector<8x128xf32>
      %29 = vector.multi_reduction <add>, %28, %cst [0] : vector<1x8x128xf32> to vector<8x128xf32>
      %30 = arith.addf %27, %29 : vector<8x128xf32>
      %c0_12 = arith.constant 0 : index
      %c0_13 = arith.constant 0 : index
      %31 = vector.load %arg4[%c0_12, %c0_13] : memref<8x128xf32, #tpu.memory_space<vmem>>, vector<8x128xf32>
      tpu.vector_store %arg4[%c0_12, %c0_13], %30 {strides = array<i32>} : memref<8x128xf32, #tpu.memory_space<vmem>>, vector<8x128xf32>,
    } else {
    }
    %c0_i32_5 = arith.constant 0 : i32
    %13 = arith.cmpi eq, %arg1, %c0_i32_5 : i32
    %14 = arith.extui %13 : i1 to i32
    %c0_i32_6 = arith.constant 0 : i32
    %15 = arith.cmpi ne, %14, %c0_i32_6 : i32
    scf.if %15 {
      %c0 = arith.constant 0 : index
      %c0_7 = arith.constant 0 : index
      %16 = vector.load %arg4[%c0, %c0_7] : memref<8x128xf32, #tpu.memory_space<vmem>>, vector<8x128xf32>
      %cst = arith.constant dense<0.000000e+00> : vector<128xf32>
      %17 = vector.multi_reduction <add>, %16, %cst [0] : vector<8x128xf32> to vector<128xf32>
      %18 = vector.shape_cast %17 : vector<128xf32> to vector<1x128xf32>
      %c0_8 = arith.constant 0 : index
      %c0_9 = arith.constant 0 : index
      %19 = vector.load %arg3[%c0_8, %c0_9] : memref<1x128xf32, #tpu.memory_space<vmem>>, vector<1x128xf32>
      tpu.vector_store %arg3[%c0_8, %c0_9], %18 {strides = array<i32>} : memref<1x128xf32, #tpu.memory_space<vmem>>, vector<1x128xf32>,
    } else {
    }
    return
  }
  func.func @transform_0(%arg0: i32, %arg1: i32) -> (i32, i32) {
    %c1_i32 = arith.constant 1 : i32
    %0 = arith.muli %arg0, %c1_i32 : i32
    %1 = arith.addi %0, %arg1 : i32
    %c0_i32 = arith.constant 0 : i32
    %2 = arith.minsi %1, %c0_i32 : i32
    %c0_i32_0 = arith.constant 0 : i32
    %c0_i32_1 = arith.constant 0 : i32
    return %2, %c0_i32_0 : i32, i32
  }
  func.func @transform_1(%arg0: i32, %arg1: i32) -> (i32, i32) {
    %c0_i32 = arith.constant 0 : i32
    %c0_i32_0 = arith.constant 0 : i32
    return %arg0, %c0_i32 : i32, i32
  }
}

</mosaic_0001>

<bundles_post_ra>
// kernel: tpu_custom_call.1
= control target key start
LH: loop header
LB: loop body
LE: loop exit
PB: predicated region body
PF: predicated region fallthrough
CT: control target
= control target key end

     0   :  { %6 = vsyncpa [#allocation4], 0  ;;  %s167_s0 = inlined_call_operand.hbm [shape: f32[8,128], index: 0, kind: input, shape index: {}]   ;;  %s168_s1 = inlined_call_operand.hbm [shape: f32[1,128], index: 1, kind: output, shape index: {}]  }
   0x1   :  { %7 = vsyncpa [#allocation5], 0  ;;  %s18_s8 = sshll.u32 %s167_s0, 4  ;;  %s149_s9 = smov [#allocation3]   ;;  %s19_s8 = int_to_ptr.hbm [resolvable:$true] %s18_s8 }
   0x2   :  { %s20_s10 = sshll.u32 %s149_s9, 4  ;;  %s21_s10 = int_to_ptr.vmem [resolvable:$true] %s20_s10 }
   0x3   :  { %23 = dma.hbm_to_vmem [thread:$0]  %s19_s8, 128, %s21_s10, [#allocation4]  }
   0x4   :  { %145 = dma.done.wait [#allocation4], 128  }
   0x5   :  { %146 = vsyncadd [#allocation4], 4294967168  ;;  %v43_v0 = vld [vmem:[#allocation3] sm:$0xff]  ;;  %s150_s11 = smov [#allocation6]   ;;  %s83_s15 = sshll.u32 %s168_s1, 4  ;;  %s84_s15 = int_to_ptr.hbm [resolvable:$true] %s83_s15 }
   0x6   :  { %v69_v1 = vrot.slane %v43_v0, 4  ;;  %s81_s12 = sshll.u32 %s150_s11, 4  ;;  %s82_s12 = int_to_ptr.vmem [resolvable:$true] %s81_s12 }
   0x8   :  { %v70_v2 = vadd.f32 %v69_v1, %v43_v0 }
   0xa   :  { %v71_v3 = vrot.slane %v70_v2, 2 }
   0xc   :  { %v72_v4 = vadd.f32 %v71_v3, %v70_v2 }
   0xe   :  { %v73_v5 = vrot.slane %v72_v4, 1 }
  0x10   :  { %v74_v6 = vadd.f32 %v73_v5, %v72_v4 }
  0x12   :  { %75 = vst [vmem:[#allocation6] sm:$0x1] %v74_v6 }
  0x13   :  { %86 = dma.vmem_to_hbm [thread:$0]  %s82_s12, 16, %s84_s15, [#allocation5]  }
  0x14   :  { %147 = dma.done.wait [#allocation5], 16  }
  0x15   :  { %148 = vsyncadd [#allocation5], 4294967280 }
  0x16   :  { %91 = vsyncpa [#allocation4], 1 }
  0x17   :  { %92 = vsyncpa [#allocation5], 1 }

</bundles_post_ra>
